<compile_context>
chip_gen: v7x
topology: tpu7x:2x2x1
jax: 0.10.0
libtpu: 0.0.40
codegen_flags: <defaults>
</compile_context>

<pallas_src>
import functools
import math

import jax
import jax.numpy as jnp
from jax.experimental import pallas as pl
from jax.experimental.pallas import tpu as pltpu


# --------------------------------------------------------------------------
# Helpers
# --------------------------------------------------------------------------
def _min_value_scalar(dtype):
    """Identity element for max, as a weakly-typed Python scalar."""
    dtype = jnp.dtype(dtype)
    if jnp.issubdtype(dtype, jnp.floating):
        return float("-inf")          # matches torch.max exactly (NaN still wins)
    if jnp.issubdtype(dtype, jnp.integer):
        return int(jnp.iinfo(dtype).min)
    return False                      # bool: max == logical or


def _largest_divisor(n, cap):
    """Largest divisor of n that is <= cap (always >= 1)."""
    cap = min(cap, n)
    if cap <= 1:
        return 1
    if cap >= n:
        return n
    best = 1
    d = 1
    while d * d <= n:
        if n % d == 0:
            q = n // d
            if d <= cap and d > best:
                best = d
            if q <= cap and q > best:
                best = q
        d += 1
    return best


def _largest_aligned_divisor(n, base, cap):
    """Largest t with t % base == 0, n % t == 0, t <= cap; None if none."""
    best = None
    t = base
    cap = min(cap, n)
    while t <= cap:
        if n % t == 0:
            best = t
        t += base
    return best


def _choose_tiles(B, N, H, itemsize, sublane, budget):
    """Pick (tB, tN, tH) for a (B, N, H) max-reduction over axis 1."""
    # ---- lane (H) tile: keep rows fully contiguous; only tile H if even a
    # single sublane-height slab of full H would blow the budget (rare).
    if sublane * H * itemsize <= budget:
        tH = H
    else:
        cap = max(128, ((budget // (sublane * itemsize)) // 128) * 128)
        tH = _largest_aligned_divisor(H, 128, cap) or H

    # ---- batch tile: pack whole (N, tH) slabs per step when they are small.
    # out_cap bounds the (sublane-padded) resident output buffer to ~2 MiB.
    per_batch = N * tH * itemsize
    out_cap = max(1, (2 << 20) // max(1, 8 * tH * itemsize))
    if per_batch <= budget:
        tB = _largest_divisor(B, max(1, min(budget // per_batch, out_cap)))
    else:
        tB = 1

    # ---- v7x megacore: ensure >= 2 "parallel" blocks for non-tiny inputs.
    total_bytes = B * N * H * itemsize
    if total_bytes >= (1 << 20) and (B // tB) * (H // tH) == 1:
        if B >= 2:
            tB = _largest_divisor(B, B // 2)
        else:
            half = _largest_aligned_divisor(H, 128, H // 2)
            if half is not None:
                tH = half

    # ---- reduction (N) tile: fill the remaining budget; prefer a divisor of
    # N so the steady-state loop needs no ragged-tile masking at all.
    per_row = tB * tH * itemsize
    budget_rows = max(sublane, budget // max(1, per_row))
    if N <= budget_rows:
        tN = N                         # full extent: always legal, contiguous
    else:
        budget_rows = max(sublane, (budget_rows // sublane) * sublane)
        tN = _largest_aligned_divisor(N, sublane, budget_rows)
        if tN is None:
            tN = min(N, budget_rows)   # ragged last tile (masked in-kernel)
    return tB, tN, tH


# --------------------------------------------------------------------------
# Kernel
# --------------------------------------------------------------------------
def _max_pool_kernel(x_ref, o_ref, *, n_total, tile_n, mask_last, min_val):
    # x_ref: (tB, tN, tH) input tile; o_ref: (tB, 1, tH) resident accumulator.
    n_idx = pl.program_id(2)

    @pl.when(n_idx == 0)
    def _init():
        o_ref[...] = jnp.full(o_ref.shape, min_val, o_ref.dtype)

    def _accumulate(x):
        o_ref[...] = jnp.maximum(o_ref[...], jnp.max(x, axis=1, keepdims=True))

    if mask_last:
        last = pl.num_programs(2) - 1

        # Steady state: one unmasked vmax per element.
        @pl.when(n_idx != last)
        def _steady():
            _accumulate(x_ref[...])

        # Ragged final tile only: neutralize out-of-range rows.
        @pl.when(n_idx == last)
        def _ragged():
            x = x_ref[...]
            row = jax.lax.broadcasted_iota(jnp.int32, x.shape, dimension=1)
            valid = row + n_idx * tile_n < n_total
            _accumulate(jnp.where(valid, x, min_val))
    else:
        _accumulate(x_ref[...])


# --------------------------------------------------------------------------
# Wrapper (== MaxPoolingLayer.forward)
# --------------------------------------------------------------------------
def max_pooling_layer(nodes: jax.Array, *, block_bytes: int = 8 << 20) -> jax.Array:
    """torch.max(nodes, dim=1)[0] for nodes of shape (B, N, H)."""
    B, N, H = nodes.shape
    dtype = jnp.dtype(nodes.dtype)
    itemsize = dtype.itemsize
    sublane = {4: 8, 2: 16, 1: 32}.get(itemsize, 8)

    # ---- small-H lane folding: (B, N, H) -> (B, N/g, g*H), g*H % 128 == 0 ---
    fold = 1
    if H < 128 and N > 1:
        g = 128 // math.gcd(H, 128)
        if g >= 2 and N >= g and N % g == 0:
            fold = g
    x = nodes.reshape(B, N // fold, fold * H) if fold > 1 else nodes
    Bx, Nx, Hx = x.shape

    tB, tN, tH = _choose_tiles(Bx, Nx, Hx, itemsize, sublane, block_bytes)
    mask_last = (Nx % tN) != 0
    min_val = _min_value_scalar(dtype)

    grid = (Bx // tB, Hx // tH, pl.cdiv(Nx, tN))

    kernel = functools.partial(
        _max_pool_kernel,
        n_total=Nx,
        tile_n=tN,
        mask_last=mask_last,
        min_val=min_val,
    )

    out3 = pl.pallas_call(
        kernel,
        out_shape=jax.ShapeDtypeStruct((Bx, 1, Hx), dtype),
        grid_spec=pl.GridSpec(
            grid=grid,
            in_specs=[pl.BlockSpec((tB, tN, tH), lambda b, h, n: (b, n, h))],
            # index_map ignores the N axis -> the (tB, 1, tH) output block
            # stays VMEM-resident across the reduction (max-accumulated).
            out_specs=pl.BlockSpec((tB, 1, tH), lambda b, h, n: (b, 0, h)),
        ),
        compiler_params=pltpu.CompilerParams(
            dimension_semantics=("parallel", "parallel", "arbitrary"),
            vmem_limit_bytes=32 * 1024 * 1024,
        ),
        cost_estimate=pl.CostEstimate(
            flops=int(B * N * H),
            transcendentals=0,
            bytes_accessed=int((B * N * H + B * H) * itemsize),
        ),
    )(x)

    if fold > 1:
        # Tiny epilogue: combine the g fold-slots back down to H lanes.
        return jnp.max(out3.reshape(B, fold, H), axis=1)
    return out3.reshape(B, H)


# --------------------------------------------------------------------------
# Self-test
# --------------------------------------------------------------------------
if __name__ == "__main__":
    key = jax.random.PRNGKey(0)
    k1, k2, k3 = jax.random.split(key, 3)

    # (batch, num_nodes, hidden) as implied by the module's forward.
    B, N, H = 2, 8, 32
    nodes = jax.random.normal(k1, (B, N, H), dtype=jnp.float32)
    pooled = jax.block_until_ready(max_pooling_layer(nodes))
    ref = jnp.max(nodes, axis=1)
    assert pooled.shape == (B, H)
    assert pooled.dtype == nodes.dtype
    assert jnp.array_equal(pooled, ref), "mismatch (small / lane-folded case)"

    # Force the tiled-reduction path with a ragged (masked) last N tile.
    nodes2 = jax.random.normal(k2, (2, 150, 128), dtype=jnp.float32)
    pooled2 = jax.block_until_ready(max_pooling_layer(nodes2, block_bytes=64 * 1024))
    assert jnp.array_equal(pooled2, jnp.max(nodes2, axis=1)), (
        "mismatch (tiled / ragged-N case)")

    # bf16, batch-packed blocks, full-extent (non-multiple-of-8) N block.
    nodes3 = jax.random.normal(k3, (4, 33, 256), dtype=jnp.float32).astype(jnp.bfloat16)
    pooled3 = jax.block_until_ready(max_pooling_layer(nodes3))
    assert jnp.array_equal(pooled3, jnp.max(nodes3, axis=1)), (
        "mismatch (bf16 batch-packed case)")

    print("KERNEL_OK")
</pallas_src>

<mosaic_0001>
module attributes {stable_mosaic.version = 11 : i64} {
  func.func @_max_pool_kernel(%arg0: i32, %arg1: i32, %arg2: i32, %arg3: memref<2x2x128xf32, #tpu.memory_space<vmem>>, %arg4: memref<2x1x128xf32, #tpu.memory_space<vmem>>) attributes {dimension_semantics = [#tpu.dimension_semantics<parallel>, #tpu.dimension_semantics<parallel>, #tpu.dimension_semantics<arbitrary>], iteration_bounds = array<i64: 1, 1, 1>, scalar_prefetch = 0 : i64, scratch_operands = 0 : i64, tpu.core_type = #tpu.core_type<tc>, window_params = [{transform_indices = @transform_0, window_bounds = array<i64: 2, 2, 128>}, {transform_indices = @transform_1, window_bounds = array<i64: 2, 1, 128>}]} {
    %c0_i32 = arith.constant 0 : i32
    %0 = arith.cmpi eq, %arg2, %c0_i32 : i32
    %1 = arith.extui %0 : i1 to i32
    %c0_i32_0 = arith.constant 0 : i32
    %2 = arith.cmpi ne, %1, %c0_i32_0 : i32
    scf.if %2 {
      %cst_9 = arith.constant 0xFF800000 : f32
      %9 = vector.broadcast %cst_9 : f32 to vector<2x1x128xf32>
      %c0_10 = arith.constant 0 : index
      %c0_11 = arith.constant 0 : index
      %c0_12 = arith.constant 0 : index
      %10 = vector.load %arg4[%c0_10, %c0_11, %c0_12] : memref<2x1x128xf32, #tpu.memory_space<vmem>>, vector<2x1x128xf32>
      tpu.vector_store %arg4[%c0_10, %c0_11, %c0_12], %9 {strides = array<i32>} : memref<2x1x128xf32, #tpu.memory_space<vmem>>, vector<2x1x128xf32>,
    } else {
    }
    %c0 = arith.constant 0 : index
    %c0_1 = arith.constant 0 : index
    %c0_2 = arith.constant 0 : index
    %3 = vector.load %arg3[%c0, %c0_1, %c0_2] : memref<2x2x128xf32, #tpu.memory_space<vmem>>, vector<2x2x128xf32>
    %c0_3 = arith.constant 0 : index
    %c0_4 = arith.constant 0 : index
    %c0_5 = arith.constant 0 : index
    %4 = vector.load %arg4[%c0_3, %c0_4, %c0_5] : memref<2x1x128xf32, #tpu.memory_space<vmem>>, vector<2x1x128xf32>
    %cst = arith.constant dense<0xFF800000> : vector<2x128xf32>
    %5 = vector.multi_reduction <maximumf>, %3, %cst [1] : vector<2x2x128xf32> to vector<2x128xf32>
    %6 = vector.shape_cast %5 : vector<2x128xf32> to vector<2x1x128xf32>
    %7 = arith.maximumf %4, %6 : vector<2x1x128xf32>
    %c0_6 = arith.constant 0 : index
    %c0_7 = arith.constant 0 : index
    %c0_8 = arith.constant 0 : index
    %8 = vector.load %arg4[%c0_6, %c0_7, %c0_8] : memref<2x1x128xf32, #tpu.memory_space<vmem>>, vector<2x1x128xf32>
    tpu.vector_store %arg4[%c0_6, %c0_7, %c0_8], %7 {strides = array<i32>} : memref<2x1x128xf32, #tpu.memory_space<vmem>>, vector<2x1x128xf32>,
    return
  }
  func.func @transform_0(%arg0: i32, %arg1: i32, %arg2: i32) -> (i32, i32, i32) {
    %c0_i32 = arith.constant 0 : i32
    return %arg0, %arg2, %arg1 : i32, i32, i32
  }
  func.func @transform_1(%arg0: i32, %arg1: i32, %arg2: i32) -> (i32, i32, i32) {
    %c0_i32 = arith.constant 0 : i32
    %c0_i32_0 = arith.constant 0 : i32
    return %arg0, %c0_i32, %arg1 : i32, i32, i32
  }
}

</mosaic_0001>

<bundles_post_ra>
// kernel: tpu_custom_call.1
= control target key start
LH: loop header
LB: loop body
LE: loop exit
PB: predicated region body
PF: predicated region fallthrough
CT: control target
= control target key end

     0   :  { %6 = vsyncpa [#allocation3], 0  ;;  %s165_s0 = inlined_call_operand.hbm [shape: f32[2,2,128], index: 0, kind: input, shape index: {}]   ;;  %s166_s1 = inlined_call_operand.hbm [shape: f32[2,1,128], index: 1, kind: output, shape index: {}]  }
   0x1   :  { %7 = vsyncpa [#allocation4], 0  ;;  %s124_s6 = smov [#allocation2]   ;;  %s76_s10 = scalar_lea.hbm %s165_s0, 64 }
   0x2   :  { %s13_s7 = sshll.u32 %s124_s6, 4  ;;  %p77_p0 = scmp.ne.s32.totalorder %s165_s0, %s76_s10  ;;  %s14_s7 = int_to_ptr.vmem [resolvable:$true] %s13_s7 }
   0x3   :  { %p80_p1 = scmp.lt.u32.totalorder %s76_s10, %s165_s0 }
   0x5   :  { %p82_p2 = pnand %p80_p1, %p77_p0 }
   0x7   :  { %85 = shalt.err (!%p82_p2)
}
   0x8   :  { %s86_s15 = scalar_lea.vmem %s14_s7, 64  ;;  %p91_p4 = scmp.lt.s32.totalorder %s14_s7, %s14_s7 }
   0x9   :  { %p87_p3 = scmp.ne.s32.totalorder %s14_s7, %s86_s15  ;;  %p92_p5 = scmp.lt.s32.totalorder %s86_s15, %s86_s15 }
   0xb   :  { %p93_p6 = por %p92_p5, %p91_p4 }
   0xd   :  { %p94_p7 = pnand %p93_p6, %p87_p3 }
   0xf   :  { %97 = shalt.err (!%p94_p7)
}
  0x10   :  { %s125_s16 = smov 32   ;;  %s126_s17 = smov 2  }
  0x11   :  { %19 = dma.hbm_to_vmem [thread:$0]  %s165_s0, 64, %s14_s7, [#allocation3], %s125_s16, %s125_s16, %s126_s17  }
  0x12   :  { %120 = dma.done.wait [#allocation3], 64  }
  0x13   :  { %121 = vsyncadd [#allocation3], 4294967232  ;;  %v127_v0 = vmov -inf   ;;  %vm33_vm0 = vcmask 1041408   ;;  %v29_v1 = vld [vmem:[#allocation2] sm:$0x3] }
  0x14   :  { %27 = vst [vmem:[#allocation5] sm:$0x1] %v127_v0  ;;  %28 = vst [vmem:[#allocation5 + $0x1] sm:$0x1] %v127_v0  ;;  %v30_v2 = vld [vmem:[#allocation2 + $0x2] sm:$0x3] }
  0x15   :  { %v34_v3 = vsel %vm33_vm0, %v29_v1, -inf  ;;  %v41_v4 = vsel %vm33_vm0, %v30_v2, -inf  ;;  %s128_s0 = smov [#allocation5]  }
  0x16   :  { %v35_v5 = vrot.slane %v34_v3, 4  ;;  %v42_v6 = vrot.slane %v41_v4, 4  ;;  %s57_s20 = sshll.u32 %s128_s0, 4  ;;  %s58_s20 = int_to_ptr.vmem [resolvable:$true] %s57_s20 }
  0x17   :  { %s98_s21 = scalar_lea.vmem %s58_s20, 32  ;;  %p103_p9 = scmp.lt.s32.totalorder %s58_s20, %s58_s20 }
  0x18   :  { %v36_v7 = vmax.f32 %v34_v3, %v35_v5  ;;  %v43_v8 = vmax.f32 %v41_v4, %v42_v6  ;;  %p99_p8 = scmp.ne.s32.totalorder %s58_s20, %s98_s21  ;;  %p104_p10 = scmp.lt.s32.totalorder %s98_s21, %s98_s21 }
  0x1a   :  { %v37_v9 = vrot.slane %v36_v7, 2  ;;  %v44_v10 = vrot.slane %v43_v8, 2  ;;  %p105_p11 = por %p104_p10, %p103_p9 }
  0x1b   :  { %v31_v15 = vld [vmem:[#allocation5] sm:$0x1]  ;;  %v32_v16 = vld [vmem:[#allocation5 + $0x1] sm:$0x1] }
  0x1c   :  { %v38_v11 = vmax.f32 %v36_v7, %v37_v9  ;;  %v45_v12 = vmax.f32 %v43_v8, %v44_v10  ;;  %p106_p12 = pnand %p105_p11, %p99_p8 }
  0x1e   :  { %v39_v13 = vrot.slane %v38_v11, 1  ;;  %v46_v14 = vrot.slane %v45_v12, 1 }
  0x20   :  { %v40_v17 = vmax.f32 %v38_v11, %v39_v13  ;;  %v47_v18 = vmax.f32 %v45_v12, %v46_v14 }
  0x22   :  { %v48_v19 = vmax.f32 %v31_v15, %v40_v17  ;;  %v49_v20 = vmax.f32 %v32_v16, %v47_v18 }
  0x24   :  { %50 = vst [vmem:[#allocation5] sm:$0x1] %v48_v19  ;;  %51 = vst [vmem:[#allocation5 + $0x1] sm:$0x1] %v49_v20 }
  0x25   :  { %109 = shalt.err (!%p106_p12)
}
  0x26   :  { %s110_s24 = scalar_lea.hbm %s166_s1, 32 }
  0x27   :  { %p111_p13 = scmp.ne.s32.totalorder %s166_s1, %s110_s24  ;;  %p114_p0 = scmp.lt.u32.totalorder %s110_s24, %s166_s1 }
  0x29   :  { %p116_p1 = pnand %p114_p0, %p111_p13 }
  0x2b   :  { %119 = shalt.err (!%p116_p1)
}
  0x2c   :  { %s129_s29 = smov 16   ;;  %s130_s30 = smov 1  }
  0x2d   :  { %63 = dma.vmem_to_hbm [thread:$0]  %s58_s20, 32, %s166_s1, [#allocation4], %s129_s29, %s129_s29, %s130_s30  }
  0x2e   :  { %122 = dma.done.wait [#allocation4], 32  }
  0x2f   :  { %123 = vsyncadd [#allocation4], 4294967264 }
  0x30   :  { %67 = vsyncpa [#allocation3], 1 }
  0x31   :  { %68 = vsyncpa [#allocation4], 1 }

</bundles_post_ra>
